<compile_context>
chip_gen: v7x
topology: tpu7x:2x2x1
jax: 0.10.0
libtpu: 0.0.40
codegen_flags: <defaults>
</compile_context>

<pallas_src>
from functools import partial

import numpy as np
import jax
import jax.numpy as jnp
from jax.experimental import pallas as pl
from jax.experimental.pallas import tpu as pltpu

_INV_SQRT2 = np.float32(0.70710678118654752440)


def _upblock_kernel(x_ref, c_ref, a_ref, bias_ref, o_ref):
    # x_ref   : (B, Hi, Cin*Wi)      input images, (ci, wi) packed along lanes
    # c_ref   : (Cin*Wi, 3*Cout*Wo)  width-upsample (x) conv(dx, ci) operator, dy taps in lane blocks
    # a_ref   : (3*Ho, Hi)           height-upsample operators, dy taps stacked along rows
    # bias_ref: (1, Cout*Wo)         conv bias replicated over wo
    # o_ref   : (B, Ho, Cout*Wo)
    B, Hi, cin_wi = x_ref.shape
    Ho = a_ref.shape[0] // 3
    CWo = o_ref.shape[2]                                     # Cout*Wo

    # Stage 1: one lane-dense matmul does the width upsample + the conv's (ci, dx) contraction.
    x2 = x_ref[...].reshape(B * Hi, cin_wi)                  # free reshape (Hi % 8 == 0)
    g = jnp.dot(x2, c_ref[...],
                preferred_element_type=jnp.float32)          # (B*Hi, 3*Cout*Wo)

    bias = bias_ref[...]                                     # (1, Cout*Wo)
    for b in range(B):                                       # static, B is small
        gb = g[b * Hi:(b + 1) * Hi, :]                       # (Hi, 3*CWo), sublane-aligned
        # Stage 2: height upsample + conv dy contraction; sublane/lane slices are tile-aligned
        # (Ho % 8 == 0, CWo % 128 == 0), so no relayouts -- just 3 accumulated MXU matmuls.
        q = jnp.dot(a_ref[0:Ho, :], gb[:, 0:CWo],
                    preferred_element_type=jnp.float32)      # (Ho, Cout*Wo)
        for dy in range(1, 3):
            q = q + jnp.dot(a_ref[dy * Ho:(dy + 1) * Ho, :],
                            gb[:, dy * CWo:(dy + 1) * CWo],
                            preferred_element_type=jnp.float32)
        q = q + bias
        # exact GELU (PyTorch nn.GELU default): 0.5 * x * (1 + erf(x / sqrt(2)))
        o_ref[b] = (0.5 * q * (1.0 + jax.lax.erf(q * _INV_SQRT2))).astype(o_ref.dtype)


@partial(jax.jit, static_argnames=("Ho", "Wo", "images_per_block"))
def upblock_forward(x_nchw, A, Ccat, bias_row, *, Ho, Wo, images_per_block=None):
    N, Cin, Hi, Wi = x_nchw.shape
    CWo3 = Ccat.shape[1]
    CWo = CWo3 // 3
    Cout = CWo // Wo

    if images_per_block is None:
        # Keep >= 2 grid steps so both v7x TensorCores get work, while batching as many
        # images per step as possible to amortize per-step pipeline overhead (v5e/v6e).
        images_per_block = max(1, N // 2)
    B = max(1, min(int(images_per_block), N))
    while N % B:
        B -= 1

    # Wrapper-side layout plumbing only: NCHW -> (N, Hi, Cin*Wi) lane-dense input slab.
    xr = jnp.transpose(x_nchw, (0, 2, 1, 3)).reshape(N, Hi, Cin * Wi)

    out_s = pl.pallas_call(
        _upblock_kernel,
        out_shape=jax.ShapeDtypeStruct((N, Ho, CWo), jnp.float32),
        grid_spec=pltpu.PrefetchScalarGridSpec(
            num_scalar_prefetch=0,
            grid=(N // B,),
            in_specs=[
                pl.BlockSpec((B, Hi, Cin * Wi), lambda n: (n, 0, 0)),
                pl.BlockSpec((Cin * Wi, CWo3), lambda n: (0, 0)),   # constant across grid
                pl.BlockSpec((3 * Ho, Hi), lambda n: (0, 0)),       # constant across grid
                pl.BlockSpec((1, CWo), lambda n: (0, 0)),           # constant across grid
            ],
            out_specs=pl.BlockSpec((B, Ho, CWo), lambda n: (n, 0, 0)),
        ),
        compiler_params=pltpu.CompilerParams(dimension_semantics=("parallel",)),
        # NOTE: at current sizes VMEM use is < 1 MiB/step; for large Hi/Wi, add an Ho-row
        # grid axis (tiling out_specs and A's rows) and set vmem_limit_bytes for v7x's 64 MiB.
    )(xr, Ccat, A, bias_row)

    # (N, Ho, Cout*Wo) -> NCHW; wrapper-side layout plumbing (tiny XLA transpose).
    return jnp.transpose(out_s.reshape(N, Ho, Cout, Wo), (0, 2, 1, 3))


# ----- host-side operator construction (parameter / glue setup) -----

def _bilinear_matrix(n_in, n_out):
    # nn.UpsamplingBilinear2d => align_corners=True: src = i * (n_in-1)/(n_out-1)
    M = np.zeros((n_out, n_in), dtype=np.float32)
    if n_out == 1 or n_in == 1:
        M[:, 0] = 1.0
        return M
    for i in range(n_out):
        src = i * (n_in - 1) / (n_out - 1)
        lo = min(int(np.floor(src)), n_in - 1)
        hi = min(lo + 1, n_in - 1)
        frac = src - lo
        M[i, lo] += 1.0 - frac
        M[i, hi] += frac
    return M


def _shifted_rows(U, d):
    # out[r] = U[r + d - 1] if in range else 0  (realizes the conv's zero padding exactly)
    n = U.shape[0]
    S = np.zeros_like(U)
    src = np.arange(n) + (d - 1)
    ok = (src >= 0) & (src < n)
    S[ok] = U[src[ok]]
    return S


def build_operators(w_hwio, bias, Hi, Wi, factor):
    """Fold the separable bilinear operators and the 3x3 conv weights into kernel operands."""
    kh, kw, Cin, Cout = w_hwio.shape
    assert kh == 3 and kw == 3, "kernel_size=3 only"
    Ho, Wo = Hi * factor, Wi * factor
    Uh = _bilinear_matrix(Hi, Ho)                                              # (Ho, Hi)
    Uw = _bilinear_matrix(Wi, Wo)                                              # (Wo, Wi)
    A = np.concatenate([_shifted_rows(Uh, dy) for dy in range(3)], axis=0)     # (3*Ho, Hi)
    Bw = np.stack([_shifted_rows(Uw, dx) for dx in range(3)], axis=0)          # (3, Wo, Wi)
    W = np.asarray(w_hwio, dtype=np.float32)                                   # (3,3,Cin,Cout) HWIO
    # Ccat[ci*Wi+wi, dy*Cout*Wo + co*Wo + wo] = sum_dx W[dy,dx,ci,co] * Bw[dx,wo,wi]
    C6 = np.einsum('yxio,xwv->ivyow', W, Bw)                                   # (Cin,Wi,3,Cout,Wo)
    Ccat = np.ascontiguousarray(C6.reshape(Cin * Wi, 3 * Cout * Wo))
    bias_row = np.repeat(np.asarray(bias, dtype=np.float32), Wo).reshape(1, Cout * Wo)
    # bf16 casts of Ccat / A / x would exploit the v6e/v7x MXU but change numerics vs PyTorch.
    return jnp.asarray(A), jnp.asarray(Ccat), jnp.asarray(bias_row), Ho, Wo


# ----- pure-JAX reference (for correctness check only) -----

def upblock_reference(x_nchw, uh, uw, w_hwio, b):
    up = jnp.einsum('oh,nchw->ncow', uh, x_nchw)
    up = jnp.einsum('pw,ncow->ncop', uw, up)                         # (N, C, Ho, Wo)
    out = jax.lax.conv_general_dilated(
        up, jnp.transpose(w_hwio, (3, 2, 0, 1)),                     # OIHW
        window_strides=(1, 1), padding='SAME',
        dimension_numbers=('NCHW', 'OIHW', 'NCHW'))
    out = out + b[None, :, None, None]
    return jax.nn.gelu(out, approximate=False)


if __name__ == "__main__":
    # UpBlock(in_nc=4, out_nc=8, up_type='upscale', factor=2, kernel_size=3, act_type='gelu')
    N, Cin, Cout, Hi, Wi, factor = 2, 4, 8, 16, 16, 2

    key = jax.random.PRNGKey(0)
    k1, k2, k3 = jax.random.split(key, 3)
    x = jax.random.normal(k1, (N, Cin, Hi, Wi), dtype=jnp.float32)
    # deterministic synthetic conv params; HWIO layout (3,3,Cin,Cout), bias (Cout,)
    w_hwio = jax.random.normal(k2, (3, 3, Cin, Cout), dtype=jnp.float32) * 0.1
    b = jax.random.normal(k3, (Cout,), dtype=jnp.float32) * 0.1

    A, Ccat, bias_row, Ho, Wo = build_operators(w_hwio, b, Hi, Wi, factor)

    out = upblock_forward(x, A, Ccat, bias_row, Ho=Ho, Wo=Wo)
    out = jax.block_until_ready(out)
    assert out.shape == (N, Cout, Ho, Wo)

    uh = jnp.asarray(_bilinear_matrix(Hi, Ho))
    uw = jnp.asarray(_bilinear_matrix(Wi, Wo))
    ref = upblock_reference(x, uh, uw, w_hwio, b)
    np.testing.assert_allclose(np.asarray(out), np.asarray(ref), rtol=1e-4, atol=1e-4)

    print("KERNEL_OK")
</pallas_src>

<mosaic_0001>
module attributes {stable_mosaic.version = 11 : i64} {
  func.func @_upblock_kernel(%arg0: i32, %arg1: memref<1x16x64xf32, #tpu.memory_space<vmem>>, %arg2: memref<64x768xf32, #tpu.memory_space<vmem>>, %arg3: memref<96x16xf32, #tpu.memory_space<vmem>>, %arg4: memref<1x256xf32, #tpu.memory_space<vmem>>, %arg5: memref<1x32x256xf32, #tpu.memory_space<vmem>>) attributes {dimension_semantics = [#tpu.dimension_semantics<parallel>], iteration_bounds = array<i64: 2>, scalar_prefetch = 0 : i64, scratch_operands = 0 : i64, tpu.core_type = #tpu.core_type<tc>, window_params = [{transform_indices = @transform_0, window_bounds = array<i64: 1, 16, 64>}, {pipeline_mode = #tpu.pipeline_mode<synchronous>, transform_indices = @transform_1, window_bounds = array<i64: 64, 768>}, {pipeline_mode = #tpu.pipeline_mode<synchronous>, transform_indices = @transform_2, window_bounds = array<i64: 96, 16>}, {pipeline_mode = #tpu.pipeline_mode<synchronous>, transform_indices = @transform_3, window_bounds = array<i64: 1, 256>}, {transform_indices = @transform_4, window_bounds = array<i64: 1, 32, 256>}]} {
    %c0 = arith.constant 0 : index
    %c0_0 = arith.constant 0 : index
    %c0_1 = arith.constant 0 : index
    %0 = vector.load %arg1[%c0, %c0_0, %c0_1] : memref<1x16x64xf32, #tpu.memory_space<vmem>>, vector<1x16x64xf32>
    %1 = vector.shape_cast %0 : vector<1x16x64xf32> to vector<16x64xf32>
    %c0_2 = arith.constant 0 : index
    %c0_3 = arith.constant 0 : index
    %2 = vector.load %arg2[%c0_2, %c0_3] : memref<64x768xf32, #tpu.memory_space<vmem>>, vector<64x768xf32>
    %cst = arith.constant dense<0.000000e+00> : vector<16x768xf32>
    %3 = tpu.matmul %1, %2, %cst {dimension_numbers = #tpu.dot_dimension_numbers<[1], [0], [0], [1], [0, 0, 1, 1], [], []>} : vector<16x64xf32>, vector<64x768xf32>, vector<16x768xf32> -> vector<16x768xf32>
    %c0_4 = arith.constant 0 : index
    %c0_5 = arith.constant 0 : index
    %4 = vector.load %arg4[%c0_4, %c0_5] : memref<1x256xf32, #tpu.memory_space<vmem>>, vector<1x256xf32>
    %c0_6 = arith.constant 0 : index
    %c0_7 = arith.constant 0 : index
    %5 = vector.load %arg3[%c0_6, %c0_7] : memref<96x16xf32, #tpu.memory_space<vmem>>, vector<32x16xf32>
    %6 = vector.extract_strided_slice %3 {offsets = [0, 0], sizes = [16, 256], strides = [1, 1]} : vector<16x768xf32> to vector<16x256xf32>
    %cst_8 = arith.constant dense<0.000000e+00> : vector<32x256xf32>
    %7 = tpu.matmul %5, %6, %cst_8 {dimension_numbers = #tpu.dot_dimension_numbers<[1], [0], [0], [1], [0, 0, 1, 1], [], []>} : vector<32x16xf32>, vector<16x256xf32>, vector<32x256xf32> -> vector<32x256xf32>
    %c32 = arith.constant 32 : index
    %c0_9 = arith.constant 0 : index
    %8 = vector.load %arg3[%c32, %c0_9] : memref<96x16xf32, #tpu.memory_space<vmem>>, vector<32x16xf32>
    %9 = vector.extract_strided_slice %3 {offsets = [0, 256], sizes = [16, 256], strides = [1, 1]} : vector<16x768xf32> to vector<16x256xf32>
    %cst_10 = arith.constant dense<0.000000e+00> : vector<32x256xf32>
    %10 = tpu.matmul %8, %9, %cst_10 {dimension_numbers = #tpu.dot_dimension_numbers<[1], [0], [0], [1], [0, 0, 1, 1], [], []>} : vector<32x16xf32>, vector<16x256xf32>, vector<32x256xf32> -> vector<32x256xf32>
    %11 = arith.addf %7, %10 : vector<32x256xf32>
    %c64 = arith.constant 64 : index
    %c0_11 = arith.constant 0 : index
    %12 = vector.load %arg3[%c64, %c0_11] : memref<96x16xf32, #tpu.memory_space<vmem>>, vector<32x16xf32>
    %13 = vector.extract_strided_slice %3 {offsets = [0, 512], sizes = [16, 256], strides = [1, 1]} : vector<16x768xf32> to vector<16x256xf32>
    %cst_12 = arith.constant dense<0.000000e+00> : vector<32x256xf32>
    %14 = tpu.matmul %12, %13, %cst_12 {dimension_numbers = #tpu.dot_dimension_numbers<[1], [0], [0], [1], [0, 0, 1, 1], [], []>} : vector<32x16xf32>, vector<16x256xf32>, vector<32x256xf32> -> vector<32x256xf32>
    %15 = arith.addf %11, %14 : vector<32x256xf32>
    %16 = vector.broadcast %4 : vector<1x256xf32> to vector<32x256xf32>
    %17 = arith.addf %15, %16 : vector<32x256xf32>
    %cst_13 = arith.constant 5.000000e-01 : f32
    %18 = vector.broadcast %cst_13 : f32 to vector<32x256xf32>
    %19 = arith.mulf %18, %17 : vector<32x256xf32>
    %cst_14 = arith.constant 0.707106769 : f32
    %20 = vector.broadcast %cst_14 : f32 to vector<32x256xf32>
    %21 = arith.mulf %17, %20 : vector<32x256xf32>
    %22 = math.erf %21 : vector<32x256xf32>
    %cst_15 = arith.constant 1.000000e+00 : f32
    %23 = vector.broadcast %cst_15 : f32 to vector<32x256xf32>
    %24 = arith.addf %23, %22 : vector<32x256xf32>
    %25 = arith.mulf %19, %24 : vector<32x256xf32>
    %c0_16 = arith.constant 0 : index
    %c0_17 = arith.constant 0 : index
    %c0_18 = arith.constant 0 : index
    %26 = vector.load %arg5[%c0_16, %c0_17, %c0_18] : memref<1x32x256xf32, #tpu.memory_space<vmem>>, vector<1x32x256xf32>
    %27 = vector.shape_cast %26 : vector<1x32x256xf32> to vector<32x256xf32>
    %28 = vector.shape_cast %25 : vector<32x256xf32> to vector<1x32x256xf32>
    tpu.vector_store %arg5[%c0_16, %c0_17, %c0_18], %28 {strides = array<i32>} : memref<1x32x256xf32, #tpu.memory_space<vmem>>, vector<1x32x256xf32>,
    return
  }
  func.func @transform_0(%arg0: i32) -> (i32, i32, i32) {
    %c0_i32 = arith.constant 0 : i32
    %c0_i32_0 = arith.constant 0 : i32
    %c0_i32_1 = arith.constant 0 : i32
    return %arg0, %c0_i32, %c0_i32_0 : i32, i32, i32
  }
  func.func @transform_1(%arg0: i32) -> (i32, i32) {
    %c0_i32 = arith.constant 0 : i32
    %c0_i32_0 = arith.constant 0 : i32
    %c0_i32_1 = arith.constant 0 : i32
    return %c0_i32, %c0_i32_0 : i32, i32
  }
  func.func @transform_2(%arg0: i32) -> (i32, i32) {
    %c0_i32 = arith.constant 0 : i32
    %c0_i32_0 = arith.constant 0 : i32
    %c0_i32_1 = arith.constant 0 : i32
    return %c0_i32, %c0_i32_0 : i32, i32
  }
  func.func @transform_3(%arg0: i32) -> (i32, i32) {
    %c0_i32 = arith.constant 0 : i32
    %c0_i32_0 = arith.constant 0 : i32
    %c0_i32_1 = arith.constant 0 : i32
    return %c0_i32, %c0_i32_0 : i32, i32
  }
  func.func @transform_4(%arg0: i32) -> (i32, i32, i32) {
    %c0_i32 = arith.constant 0 : i32
    %c0_i32_0 = arith.constant 0 : i32
    %c0_i32_1 = arith.constant 0 : i32
    return %arg0, %c0_i32, %c0_i32_0 : i32, i32, i32
  }
}

</mosaic_0001>

<bundles_post_ra>
// kernel: upblock_forward.1
= control target key start
LH: loop header
LB: loop body
LE: loop exit
PB: predicated region body
PF: predicated region fallthrough
CT: control target
= control target key end

     0   :  { %s1099_s15 = smov 0   ;;  %s1358_s0 = inlined_call_operand.vmem [shape: f32[2,16,64], index: 0, kind: input, shape index: {}]   ;;  %s1359_s1 = inlined_call_operand.vmem [shape: f32[64,768], index: 1, kind: input, shape index: {}]   ;;  %s1360_s2 = inlined_call_operand.vmem [shape: f32[96,16], index: 2, kind: input, shape index: {}]   ;;  %s1361_s3 = inlined_call_operand.vmem [shape: f32[1,256], index: 3, kind: input, shape index: {}]   ;;  %s1362_s4 = inlined_call_operand.vmem [shape: f32[2,32,256], index: 4, kind: output, shape index: {}]  }
   0x1 LB: > { %s933_s16 = sadd.s32 4294967295, %s1071_s15   ;;  %p937_p0 = scmp.ge.s32.totalorder %s1071_s15, 1  ;;  %s1071_s15 = sphi %s1099_s15, %s14_s15  }
   0x2   : > { %p162_p1 = scmp.lt.s32.totalorder %s1071_s15, 3 }
   0x4   : > { %p163_p2 = pnand %p937_p0, %p162_p1 }
   0x5   : > { %v201_v0 = vld [vmem:[%s1359_s1 + $0x8] sm:$0xff] (!%p163_p2)  ;;  %v207_v1 = vld [vmem:[%s1359_s1 + $0x38] sm:$0xff] (!%p163_p2)  ;;  %v200_v2 = vld [vmem:[%s1359_s1] sm:$0xff] (!%p163_p2)  ;;  %v1073_v7 = vmov (!%p163_p2), 0.0   ;;  %p188_p3 = scmp.lt.s32.totalorder (!%p163_p2), %s933_s16, 1  ;;  %vm248_vm0 = vcmask (!%p163_p2), 523264  }
   0x6   : > { %166 = sbr.rel (%p163_p2) target bundleno = 540 (0x21c), region = 36  ;;  %v964_v3 = vpack.c.bf16 (!%p163_p2), %v207_v1, %v201_v0  ;;  %v206_v4 = vld [vmem:[%s1359_s1 + $0x30] sm:$0xff] (!%p163_p2)  ;;  %v213_v5 = vld [vmem:[%s1359_s1 + $0x68] sm:$0xff] (!%p163_p2)  ;;  %v219_v6 = vld [vmem:[%s1359_s1 + $0x98] sm:$0xff] (!%p163_p2)  ;;  %319 = vmatprep.mubr.f32.mxu0 (!%p163_p2), %v1073_v7  ;;  %572 = vmatprep.mubr.f32.mxu1 (!%p163_p2), %v1073_v7  ;;  %vm495_vm1 = vcmask (!%p163_p2), 130048  }
   0x7   : > { %v966_v8 = vpack.c.bf16 (!%p163_p2), %v206_v4, %v200_v2  ;;  %v968_v9 = vpack.c.bf16 (!%p163_p2), %v219_v6, %v213_v5  ;;  %v212_v10 = vld [vmem:[%s1359_s1 + $0x60] sm:$0xff] (!%p163_p2)  ;;  %v218_v11 = vld [vmem:[%s1359_s1 + $0x90] sm:$0xff] (!%p163_p2)  ;;  %v225_v12 = vld [vmem:[%s1359_s1 + $0xc8] sm:$0xff] (!%p163_p2) }
   0x8   : > { %965 = vmatprep.subr.bf16.mxu0 (!%p163_p2), %v964_v3  ;;  %v231_v13 = vld [vmem:[%s1359_s1 + $0xf8] sm:$0xff] (!%p163_p2)  ;;  %v970_v14 = vpack.c.bf16 (!%p163_p2), %v218_v11, %v212_v10  ;;  %v224_v16 = vld [vmem:[%s1359_s1 + $0xc0] sm:$0xff] (!%p163_p2)  ;;  %v230_v17 = vld [vmem:[%s1359_s1 + $0xf0] sm:$0xff] (!%p163_p2) }
   0x9   : > { %967 = vmatpush1.bf16.msra.mxu0 (!%p163_p2), %v966_v8  ;;  %v972_v15 = vpack.c.bf16 (!%p163_p2), %v231_v13, %v225_v12  ;;  %v237_v18 = vld [vmem:[%s1359_s1 + $0x128] sm:$0xff] (!%p163_p2)  ;;  %v243_v19 = vld [vmem:[%s1359_s1 + $0x158] sm:$0xff] (!%p163_p2)  ;;  %v974_v20 = vpack.c.bf16 (!%p163_p2), %v230_v17, %v224_v16  ;;  %v236_v22 = vld [vmem:[%s1359_s1 + $0x120] sm:$0xff] (!%p163_p2) }
   0xa   : > { %969 = vmatprep.subr.bf16.mxu0 (!%p163_p2), %v968_v9  ;;  %v976_v21 = vpack.c.bf16 (!%p163_p2), %v243_v19, %v237_v18  ;;  %v242_v23 = vld [vmem:[%s1359_s1 + $0x150] sm:$0xff] (!%p163_p2)  ;;  %v203_v24 = vld [vmem:[%s1359_s1 + $0x18] sm:$0xff] (!%p163_p2)  ;;  %v209_v25 = vld [vmem:[%s1359_s1 + $0x48] sm:$0xff] (!%p163_p2) }
   0xb   : > { %v978_v26 = vpack.c.bf16 (!%p163_p2), %v242_v23, %v236_v22  ;;  %v980_v27 = vpack.c.bf16 (!%p163_p2), %v209_v25, %v203_v24  ;;  %v202_v28 = vld [vmem:[%s1359_s1 + $0x10] sm:$0xff] (!%p163_p2)  ;;  %v208_v29 = vld [vmem:[%s1359_s1 + $0x40] sm:$0xff] (!%p163_p2)  ;;  %v215_v30 = vld [vmem:[%s1359_s1 + $0x78] sm:$0xff] (!%p163_p2) }
   0xc   : > { %v221_v31 = vld [vmem:[%s1359_s1 + $0xa8] sm:$0xff] (!%p163_p2)  ;;  %v982_v33 = vpack.c.bf16 (!%p163_p2), %v208_v29, %v202_v28  ;;  %v214_v35 = vld [vmem:[%s1359_s1 + $0x70] sm:$0xff] (!%p163_p2)  ;;  %v220_v36 = vld [vmem:[%s1359_s1 + $0xa0] sm:$0xff] (!%p163_p2) }
   0xd   : > { %s1364_s16 = smov (!%p188_p3, %s933_s16), 1  ;;  %971 = vmatpush1.bf16.msra.mxu0 %v970_v14  ;;  %v984_v34 = vpack.c.bf16 %v221_v31, %v215_v30  ;;  %v227_v37 = vld [vmem:[%s1359_s1 + $0xd8] sm:$0xff]  ;;  %v233_v38 = vld [vmem:[%s1359_s1 + $0x108] sm:$0xff]  ;;  %v986_v40 = vpack.c.bf16 %v220_v36, %v214_v35  ;;  %v226_v42 = vld [vmem:[%s1359_s1 + $0xd0] sm:$0xff] }
   0xe   : > { %973 = vmatprep.subr.bf16.mxu0 %v972_v15  ;;  %s962_s25 = sshll.u32 %s1364_s16, 4  ;;  %v988_v41 = vpack.c.bf16 %v233_v38, %v227_v37  ;;  %v232_v43 = vld [vmem:[%s1359_s1 + $0x100] sm:$0xff]  ;;  %v239_v44 = vld [vmem:[%s1359_s1 + $0x138] sm:$0xff]  ;;  %v245_v45 = vld [vmem:[%s1359_s1 + $0x168] sm:$0xff]  ;;  %s963_s23 = sshll.u32 %s1364_s16, 6 }
   0xf   : > { %s192_s6 = scalar_lea.vmem %s1358_s0, %s962_s25  ;;  %v990_v46 = vpack.c.bf16 %v232_v43, %v226_v42  ;;  %v992_v47 = vpack.c.bf16 %v245_v45, %v239_v44  ;;  %v238_v48 = vld [vmem:[%s1359_s1 + $0x130] sm:$0xff]  ;;  %v244_v49 = vld [vmem:[%s1359_s1 + $0x160] sm:$0xff]  ;;  %v205_v50 = vld [vmem:[%s1359_s1 + $0x28] sm:$0xff]  ;;  %v812_v42 = vlaneseq  ;;  %s1345_s26 = scalar_lea.vmem %s1362_s4, %s963_s23 }
  0x10   : > { %v1185_v32 = vld [vmem:[%s192_s6] sm:$0xff]  ;;  %v199_v39 = vld [vmem:[%s192_s6 + $0x8] sm:$0xff]  ;;  %v211_v51 = vld [vmem:[%s1359_s1 + $0x58] sm:$0xff]  ;;  %v994_v52 = vpack.c.bf16 %v244_v49, %v238_v48 }
  0x11   : > { %975 = vmatpush1.bf16.msra.mxu0 %v974_v20  ;;  %v996_v53 = vpack.c.bf16 %v211_v51, %v205_v50  ;;  %v204_v54 = vld [vmem:[%s1359_s1 + $0x20] sm:$0xff]  ;;  %v210_v55 = vld [vmem:[%s1359_s1 + $0x50] sm:$0xff]  ;;  %v217_v56 = vld [vmem:[%s1359_s1 + $0x88] sm:$0xff]  ;;  %v813_v43 = vshrl.u32 %v812_v42, 7 }
  0x12   : > { %977 = vmatprep.subr.bf16.mxu0 %v976_v21  ;;  %v223_v57 = vld [vmem:[%s1359_s1 + $0xb8] sm:$0xff]  ;;  %v998_v58 = vpack.c.bf16 %v210_v55, %v204_v54  ;;  %v216_v60 = vld [vmem:[%s1359_s1 + $0x80] sm:$0xff]  ;;  %v222_v61 = vld [vmem:[%s1359_s1 + $0xb0] sm:$0xff] }
  0x13   : > { %v1000_v59 = vpack.c.bf16 %v223_v57, %v217_v56  ;;  %v229_v62 = vld [vmem:[%s1359_s1 + $0xe8] sm:$0xff]  ;;  %v235_v63 = vld [vmem:[%s1359_s1 + $0x118] sm:$0xff]  ;;  %v1002_v0 = vpack.c.bf16 %v222_v61, %v216_v60  ;;  %v228_v2 = vld [vmem:[%s1359_s1 + $0xe0] sm:$0xff]  ;;  %v814_v44 = vsub.s32 0, %v813_v43 }
  0x14   : > { %v1004_v1 = vpack.c.bf16 %v235_v63, %v229_v62  ;;  %v234_v3 = vld [vmem:[%s1359_s1 + $0x110] sm:$0xff]  ;;  %v241_v4 = vld [vmem:[%s1359_s1 + $0x148] sm:$0xff]  ;;  %v247_v5 = vld [vmem:[%s1359_s1 + $0x178] sm:$0xff] }
  0x15   : > { %979 = vmatpush1.bf16.msra.mxu0 %v978_v26  ;;  %v1006_v6 = vpack.c.bf16 %v234_v3, %v228_v2  ;;  %v1008_v8 = vpack.c.bf16 %v247_v5, %v241_v4  ;;  %v240_v9 = vld [vmem:[%s1359_s1 + $0x140] sm:$0xff]  ;;  %v246_v10 = vld [vmem:[%s1359_s1 + $0x170] sm:$0xff]  ;;  %v492_v25 = vld [vmem:[%s1360_s2 + $0x28] sm:$0xff] }
  0x16   : > { %981 = vmatprep.subr.bf16.mxu0 %v980_v27  ;;  %v1010_v11 = vpack.c.bf16 %v246_v10, %v240_v9  ;;  %v491_v24 = vld [vmem:[%s1360_s2 + $0x20] sm:$0xff]  ;;  %v493_v28 = vld [vmem:[%s1360_s2 + $0x30] sm:$0xff]  ;;  %v488_v35 = vld [vmem:[%s1360_s2 + $0x8] sm:$0xff] }
  0x17   : > { %v489_v36 = vld [vmem:[%s1360_s2 + $0x10] sm:$0xff]  ;;  %v490_v37 = vld [vmem:[%s1360_s2 + $0x18] sm:$0xff]  ;;  %v698_v38 = vld [vmem:[%s1360_s2 + $0x40] sm:$0xff] }
  0x18   : > { %942 = vmatmul.mubr.msk.f32.vlgmr.msra.gmra.mrb[0].mxu0 %vm248_vm0, %v1185_v32  ;;  %v486_v45 = vld [vmem:[%s1361_s3] sm:$0x3] }
  0x19   : > { %983 = vmatpush1.bf16.msra.mxu0 %v982_v33  ;;  %325 = vmatprep.mubr.f32.mxu0 %v1073_v7 }
  0x1a   : > { %985 = vmatprep.subr.bf16.mxu0 %v984_v34  ;;  %v487_v34 = vld [vmem:[%s1360_s2] sm:$0xff] }
  0x1c   : > { %943 = vmatmul.mubr.msk.f32.gmra.mrb[2].mxu0 %vm248_vm0, %v199_v39 }
  0x1d   : > { %987 = vmatpush1.bf16.msra.mxu0 %v986_v40  ;;  %396 = vmatprep.mubr.f32.mxu0 %v1073_v7  ;;  %v700_v40 = vld [vmem:[%s1360_s2 + $0x50] sm:$0xff] }
  0x1e   : > { %989 = vmatprep.subr.bf16.mxu0 %v988_v41  ;;  %v701_v41 = vld [vmem:[%s1360_s2 + $0x58] sm:$0xff] }
  0x21   : > { %991 = vmatpush1.bf16.msra.mxu0 %v990_v46  ;;  %v818_v46 = vsub.s32 1, %v813_v43 }
  0x22   : > { %993 = vmatprep.subr.bf16.mxu0 %v992_v47  ;;  %v815_v47 = vrot.slane %v486_v45, %v814_v44 }
  0x23   : > { %v819_v48 = vrot.slane %v486_v45, %v818_v46 }
  0x25   : > { %995 = vmatpush1.bf16.msra.mxu0 %v994_v52 }
  0x26   : > { %997 = vmatprep.subr.bf16.mxu0 %v996_v53 }
  0x28   : > { %944 = vmatmul.mubr.msk.f32.vlgmr.msra.gmra.mrb[4].mxu0 %vm248_vm0, %v1185_v32 }
  0x29   : > { %999 = vmatpush1.bf16.msra.mxu0 %v998_v58  ;;  %402 = vmatprep.mubr.f32.mxu0 %v1073_v7 }
  0x2a   : > { %1001 = vmatprep.subr.bf16.mxu0 %v1000_v59 }
  0x2c   : > { %945 = vmatmul.mubr.msk.f32.gmra.mrb[6].mxu0 %vm248_vm0, %v199_v39 }
  0x2d   : > { %1003 = vmatpush1.bf16.msra.mxu0 %v1002_v0  ;;  %473 = vmatprep.mubr.f32.mxu0 %v1073_v7 }
  0x2e   : > { %1005 = vmatprep.subr.bf16.mxu0 %v1004_v1 }
  0x31   : > { %1007 = vmatpush1.bf16.msra.mxu0 %v1006_v6 }
  0x32   : > { %1009 = vmatprep.subr.bf16.mxu0 %v1008_v8 }
  0x35   : > { %1011 = vmatpush1.bf16.msra.mxu0 %v1010_v11 }
  0x38   : > { %946 = vmatmul.mubr.msk.f32.vlgmr.msra.gmra.mrb[8].mxu0 %vm248_vm0, %v1185_v32  ;;  %v494_v32 = vld [vmem:[%s1360_s2 + $0x38] sm:$0xff] }
  0x39   : > { %479 = vmatprep.mubr.f32.mxu0 %v1073_v7 }
  0x3c   : > { %947 = vmatmul.mubr.msk.f32.gmra.mrb[10].mxu0 %vm248_vm0, %v199_v39  ;;  %v699_v39 = vld [vmem:[%s1360_s2 + $0x48] sm:$0xff] }
  0xeb   : > { %v321_v12 = vpop.f32.mrb[0].mxu0 }
  0xec   : > { %v323_v13 = vpop.f32.mrb[1].mxu0 }
  0xef   : > { %v327_v14 = vpop.f32.mrb[2].mxu0 }
  0xf0   : > { %v1018_v15 = vpack.c.bf16 %v327_v14, %v321_v12  ;;  %v329_v16 = vpop.f32.mrb[3].mxu0 }
  0xf1   : > { %v1016_v17 = vpack.c.bf16 %v329_v16, %v323_v13 }
  0xfb   : > { %v398_v18 = vpop.f32.mrb[4].mxu0 }
  0xfc   : > { %v400_v19 = vpop.f32.mrb[5].mxu0 }
  0xff   : > { %v404_v20 = vpop.f32.mrb[6].mxu0 }
 0x100   : > { %v1014_v21 = vpack.c.bf16 %v404_v20, %v398_v18  ;;  %v406_v22 = vpop.f32.mrb[7].mxu0 }
 0x101   : > { %v1012_v23 = vpack.c.bf16 %v406_v22, %v400_v19 }
 0x103   : > { %1013 = vmatprep.subr.bf16.mxu1 %v1012_v23 }
 0x104   : > { %1015 = vmatpush1.bf16.msra.mxu1 %v1014_v21 }
 0x105   : > { %1017 = vmatprep.subr.bf16.mxu1 %v1016_v17 }
 0x107   : > { %948 = vmatmul.mubr.msk.f32.vlgmr.msra.gmra.mrb[0].mxu1 %vm495_vm1, %v491_v24 }
 0x108   : > { %1019 = vmatpush1.bf16.msra.mxu1 %v1018_v15  ;;  %578 = vmatprep.mubr.f32.mxu1 %v1073_v7 }
 0x10b   : > { %949 = vmatmul.mubr.msk.f32.gmra.mrb[2].mxu1 %vm495_vm1, %v492_v25  ;;  %v475_v26 = vpop.f32.mrb[8].mxu0 }
 0x10c   : > { %v477_v27 = vpop.f32.mrb[9].mxu0  ;;  %584 = vmatprep.mubr.f32.mxu1 %v1073_v7 }
 0x10f   : > { %v481_v29 = vpop.f32.mrb[10].mxu0  ;;  %950 = vmatmul.mubr.msk.f32.gmra.mrb[4].mxu1 %vm495_vm1, %v493_v28 }
 0x110   : > { %v1022_v30 = vpack.c.bf16 %v481_v29, %v475_v26  ;;  %v483_v31 = vpop.f32.mrb[11].mxu0  ;;  %590 = vmatprep.mubr.f32.mxu1 %v1073_v7 }
 0x111   : > { %v1020_v33 = vpack.c.bf16 %v483_v31, %v477_v27 }
 0x113   : > { %951 = vmatmul.mubr.msk.f32.gmra.mrb[6].mxu1 %vm495_vm1, %v494_v32  ;;  %1021 = vmatprep.subr.bf16.mxu1 %v1020_v33 }
 0x114   : > { %673 = vmatprep.mubr.f32.mxu1 %v1073_v7 }
 0x117   : > { %952 = vmatmul.mubr.msk.f32.vlgmr.msra.gmra.mrb[0].mxu1 %vm495_vm1, %v487_v34 }
 0x118   : > { %1023 = vmatpush1.bf16.msra.mxu1 %v1022_v30  ;;  %679 = vmatprep.mubr.f32.mxu1 %v1073_v7 }
 0x11b   : > { %953 = vmatmul.mubr.msk.f32.gmra.mrb[2].mxu1 %vm495_vm1, %v488_v35 }
 0x11c   : > { %685 = vmatprep.mubr.f32.mxu1 %v1073_v7 }
 0x11f   : > { %954 = vmatmul.mubr.msk.f32.gmra.mrb[4].mxu1 %vm495_vm1, %v489_v36 }
 0x120   : > { %691 = vmatprep.mubr.f32.mxu1 %v1073_v7 }
 0x123   : > { %955 = vmatmul.mubr.msk.f32.gmra.mrb[6].mxu1 %vm495_vm1, %v490_v37 }
 0x124   : > { %778 = vmatprep.mubr.f32.mxu1 %v1073_v7 }
 0x127   : > { %956 = vmatmul.mubr.msk.f32.vlgmr.msra.gmra.mrb[0].mxu1 %vm495_vm1, %v698_v38 }
 0x128   : > { %784 = vmatprep.mubr.f32.mxu1 %v1073_v7 }
 0x12b   : > { %957 = vmatmul.mubr.msk.f32.gmra.mrb[2].mxu1 %vm495_vm1, %v699_v39 }
 0x12c   : > { %790 = vmatprep.mubr.f32.mxu1 %v1073_v7 }
 0x12f   : > { %958 = vmatmul.mubr.msk.f32.gmra.mrb[4].mxu1 %vm495_vm1, %v700_v40 }
 0x130   : > { %796 = vmatprep.mubr.f32.mxu1 %v1073_v7 }
 0x133   : > { %959 = vmatmul.mubr.msk.f32.gmra.mrb[6].mxu1 %vm495_vm1, %v701_v41 }
 0x1fa   : > { %v780_v49 = vpop.f32.mrb[0].mxu1 }
 0x1fb   : > { %v822_v50 = vadd.f32 %v815_v47, %v780_v49  ;;  %v782_v51 = vpop.f32.mrb[1].mxu1 }
 0x1fc   : > { %v823_v7 = vadd.f32 %v819_v48, %v782_v51 }
 0x1fd   : > { %v838_v52 = vmul.f32 0.70710677, %v822_v50  ;;  %v830_v10 = vmul.f32 0.5, %v822_v50 }
 0x1fe   : > { %v839_v53 = vmul.f32 0.70710677, %v823_v7  ;;  %v786_v54 = vpop.f32.mrb[2].mxu1  ;;  %v831_v13 = vmul.f32 0.5, %v823_v7 }
 0x1ff   : > { %1049 = verf.f32 %v838_v52  ;;  %v824_v55 = vadd.f32 %v815_v47, %v786_v54  ;;  %v788_v56 = vpop.f32.mrb[3].mxu1 }
 0x200   : > { %1051 = verf.f32 %v839_v53  ;;  %v825_v57 = vadd.f32 %v819_v48, %v788_v56 }
 0x201   : > { %v840_v58 = vmul.f32 0.70710677, %v824_v55  ;;  %v832_v19 = vmul.f32 0.5, %v824_v55 }
 0x202   : > { %v841_v59 = vmul.f32 0.70710677, %v825_v57  ;;  %v792_v60 = vpop.f32.mrb[4].mxu1  ;;  %v833_v21 = vmul.f32 0.5, %v825_v57 }
 0x203   : > { %1053 = verf.f32 %v840_v58  ;;  %v826_v61 = vadd.f32 %v815_v47, %v792_v60  ;;  %v794_v62 = vpop.f32.mrb[5].mxu1 }
 0x204   : > { %1055 = verf.f32 %v841_v59  ;;  %v827_v63 = vadd.f32 %v819_v48, %v794_v62 }
 0x205   : > { %v842_v0 = vmul.f32 0.70710677, %v826_v61  ;;  %v834_v27 = vmul.f32 0.5, %v826_v61 }
 0x206   : > { %v843_v1 = vmul.f32 0.70710677, %v827_v63  ;;  %v798_v2 = vpop.f32.mrb[6].mxu1  ;;  %v835_v29 = vmul.f32 0.5, %v827_v63 }
 0x207   : > { %1057 = verf.f32 %v842_v0  ;;  %v828_v3 = vadd.f32 %v815_v47, %v798_v2  ;;  %v800_v4 = vpop.f32.mrb[7].mxu1 }
 0x208   : > { %1059 = verf.f32 %v843_v1  ;;  %v829_v5 = vadd.f32 %v819_v48, %v800_v4 }
 0x209   : > { %v1050_v6 = vpop.eup %1049  ;;  %v844_v8 = vmul.f32 0.70710677, %v828_v3  ;;  %v836_v35 = vmul.f32 0.5, %v828_v3 }
 0x20a   : > { %v1052_v9 = vpop.eup %1051  ;;  %v854_v11 = vadd.f32 1.0, %v1050_v6  ;;  %v845_v12 = vmul.f32 0.70710677, %v829_v5  ;;  %v837_v37 = vmul.f32 0.5, %v829_v5 }
 0x20b   : > { %v855_v14 = vadd.f32 1.0, %v1052_v9  ;;  %1061 = verf.f32 %v844_v8 }
 0x20c   : > { %v862_v15 = vmul.f32 %v854_v11, %v830_v10  ;;  %1063 = verf.f32 %v845_v12 }
 0x20d   : > { %v1054_v16 = vpop.eup %1053  ;;  %v863_v17 = vmul.f32 %v855_v14, %v831_v13 }
 0x20e   : > { %v1056_v18 = vpop.eup %1055  ;;  %870 = vst [vmem:[%s1345_s26] sm:$0xff] %v862_v15  ;;  %v856_v20 = vadd.f32 1.0, %v1054_v16 }
 0x20f   : > { %871 = vst [vmem:[%s1345_s26 + $0x8] sm:$0xff] %v863_v17  ;;  %v857_v22 = vadd.f32 1.0, %v1056_v18 }
 0x210   : > { %v864_v23 = vmul.f32 %v856_v20, %v832_v19 }
 0x211   : > { %v1058_v24 = vpop.eup %1057  ;;  %v865_v25 = vmul.f32 %v857_v22, %v833_v21 }
 0x212   : > { %v1060_v26 = vpop.eup %1059  ;;  %872 = vst [vmem:[%s1345_s26 + $0x10] sm:$0xff] %v864_v23  ;;  %v858_v28 = vadd.f32 1.0, %v1058_v24 }
 0x213   : > { %873 = vst [vmem:[%s1345_s26 + $0x18] sm:$0xff] %v865_v25  ;;  %v859_v30 = vadd.f32 1.0, %v1060_v26 }
 0x214   : > { %v866_v31 = vmul.f32 %v858_v28, %v834_v27 }
 0x215   : > { %v1062_v32 = vpop.eup %1061  ;;  %v867_v33 = vmul.f32 %v859_v30, %v835_v29 }
 0x216   : > { %v1064_v34 = vpop.eup %1063  ;;  %874 = vst [vmem:[%s1345_s26 + $0x20] sm:$0xff] %v866_v31  ;;  %v860_v36 = vadd.f32 1.0, %v1062_v32 }
 0x217   : > { %875 = vst [vmem:[%s1345_s26 + $0x28] sm:$0xff] %v867_v33  ;;  %v861_v38 = vadd.f32 1.0, %v1064_v34 }
 0x218   : > { %v868_v39 = vmul.f32 %v860_v36, %v836_v35 }
 0x219   : > { %v869_v40 = vmul.f32 %v861_v38, %v837_v37 }
 0x21a   : > { %876 = vst [vmem:[%s1345_s26 + $0x30] sm:$0xff] %v868_v39 }
 0x21b   : > { %877 = vst [vmem:[%s1345_s26 + $0x38] sm:$0xff] %v869_v40 }
 0x21c PF: > { %s14_s15 = sadd.s32 1, %s1071_s15  }
 0x21d   : > { %p11_p4 = scmp.ge.s32.totalorder %s14_s15, 4  }
 0x21f   :  { %13 = sbr.rel (!%p11_p4) target bundleno = 1 (0x1), region = 66 }

</bundles_post_ra>
